<compile_context>
chip_gen: v5e
topology: v5e:2x2
jax: 0.10.0
libtpu: 0.0.40
codegen_flags: <defaults>
</compile_context>

<pallas_src>
import functools

import jax
import jax.numpy as jnp
from jax.experimental import pallas as pl
from jax.experimental.pallas import tpu as pltpu

_DIMS = (784, 32, 24, 18, 12, 10)


def _round_up(n, m):
    return (n + m - 1) // m * m


def _sigmoid(z):
    # exp and reciprocal both go to the EUP slot (free in a mem-bound kernel).
    return pl.reciprocal(1.0 + jnp.exp(-z), approx=True)


def _simplenet_kernel(
    x_ref,
    w1_ref, b1_ref,
    w2_ref, b2_ref,
    w3_ref, b3_ref,
    w4_ref, b4_ref,
    w5_ref, b5_ref,
    out_ref, x1_ref, x2_ref, x3_ref, x4_ref,
):
    # x_ref: (TB, 784) f32 streamed from HBM; cast to bf16 in-kernel (under DMA).
    x = x_ref[...].astype(jnp.bfloat16)

    # fc1..fc4 + sigmoid (bf16 MXU inputs, f32 accumulate)
    z1 = jnp.dot(x, w1_ref[...], preferred_element_type=jnp.float32) + b1_ref[...]
    x1 = _sigmoid(z1)
    z2 = jnp.dot(x1.astype(jnp.bfloat16), w2_ref[...],
                 preferred_element_type=jnp.float32) + b2_ref[...]
    x2 = _sigmoid(z2)
    z3 = jnp.dot(x2.astype(jnp.bfloat16), w3_ref[...],
                 preferred_element_type=jnp.float32) + b3_ref[...]
    x3 = _sigmoid(z3)
    z4 = jnp.dot(x3.astype(jnp.bfloat16), w4_ref[...],
                 preferred_element_type=jnp.float32) + b4_ref[...]
    x4 = _sigmoid(z4)
    # fc5 (no activation)
    z5 = jnp.dot(x4.astype(jnp.bfloat16), w5_ref[...],
                 preferred_element_type=jnp.float32) + b5_ref[...]

    # Direct per-output stores (no slab, no concat, no pad).
    out_ref[...] = z5                      # f32 logits
    x1_ref[...] = x1.astype(jnp.bfloat16)  # bf16 activations
    x2_ref[...] = x2.astype(jnp.bfloat16)
    x3_ref[...] = x3.astype(jnp.bfloat16)
    x4_ref[...] = x4.astype(jnp.bfloat16)


@functools.partial(jax.jit, static_argnames=("tile_b",))
def simplenet_forward(x, params, *, tile_b=2048):
    """Fused SimpleNet forward.

    Args:
      x: (B, 784) f32 input (streamed to the kernel in its native dtype).
      params: dict with w1..w5 (PyTorch layout (out, in)) and b1..b5.
      tile_b: batch tile. 2048 is safe on v7x (64 MiB VMEM) and keeps >=2 grid
              steps for the 2 TensorCores; raise toward 4096-8192 on v5e/v6e.

    Returns:
      (out_f32, (x1, x2, x3, x4)) with activations stored as bf16
      (MXU inputs are bf16 anyway, so accuracy is unchanged at ~1e-2).
    """
    dims = _DIMS
    B = x.shape[0]

    # Pad batch to a multiple of 8 (sublane) and of the tile.
    Bp = _round_up(max(B, 8), 8)
    TB = _round_up(min(tile_b, Bp), 8)
    Bp = _round_up(Bp, TB)

    x_p = x.astype(jnp.float32)
    if Bp != B:
        x_p = jnp.pad(x_p, ((0, Bp - B), (0, 0)))

    # Inputs: x (f32), then (wT bf16, b f32) per layer (weights pre-transposed).
    flat_inputs = [x_p]
    for li in range(1, 6):
        flat_inputs.append(jnp.transpose(params[f"w{li}"]).astype(jnp.bfloat16))
        flat_inputs.append(params[f"b{li}"].reshape(1, dims[li]).astype(jnp.float32))

    # x / outputs march over the batch grid; weights & biases stay VMEM-resident.
    in_specs = [pl.BlockSpec((TB, dims[0]), lambda b: (b, 0))]
    for li in range(1, 6):
        in_specs.append(pl.BlockSpec((dims[li - 1], dims[li]), lambda b: (0, 0)))
        in_specs.append(pl.BlockSpec((1, dims[li]), lambda b: (0, 0)))

    out_shape = (
        jax.ShapeDtypeStruct((Bp, dims[5]), jnp.float32),   # logits
        jax.ShapeDtypeStruct((Bp, dims[1]), jnp.bfloat16),  # x1
        jax.ShapeDtypeStruct((Bp, dims[2]), jnp.bfloat16),  # x2
        jax.ShapeDtypeStruct((Bp, dims[3]), jnp.bfloat16),  # x3
        jax.ShapeDtypeStruct((Bp, dims[4]), jnp.bfloat16),  # x4
    )
    out_specs = (
        pl.BlockSpec((TB, dims[5]), lambda b: (b, 0)),
        pl.BlockSpec((TB, dims[1]), lambda b: (b, 0)),
        pl.BlockSpec((TB, dims[2]), lambda b: (b, 0)),
        pl.BlockSpec((TB, dims[3]), lambda b: (b, 0)),
        pl.BlockSpec((TB, dims[4]), lambda b: (b, 0)),
    )

    # Advisory cost estimate (mem-bound kernel).
    mm_terms = sum(dims[i] * dims[i + 1] for i in range(5))
    act_lanes = sum(dims[1:5])
    cost = pl.CostEstimate(
        flops=2 * Bp * mm_terms,
        transcendentals=2 * Bp * act_lanes,   # exp + approx reciprocal per sigmoid lane
        bytes_accessed=(Bp * dims[0] * 4                       # x f32 in
                        + Bp * (act_lanes * 2 + dims[5] * 4)   # bf16 acts + f32 logits out
                        + 2 * mm_terms + 4 * sum(dims[1:])),   # weights + biases
    )

    # VMEM accounting: double-buffered f32 x tiles, in-kernel bf16 cast of x,
    # double-buffered outputs (counted as f32 for slack), in-body temporaries,
    # resident weights/biases + bookkeeping.
    hidden_sum = sum(dims[1:])  # 96
    vmem_needed = (2 * TB * dims[0] * 4
                   + TB * dims[0] * 2
                   + 2 * TB * hidden_sum * 4
                   + TB * hidden_sum * 16
                   + (2 << 20))
    vmem_limit = int(min(max(vmem_needed, 32 << 20), 100 << 20))

    out, x1, x2, x3, x4 = pl.pallas_call(
        _simplenet_kernel,
        grid=(Bp // TB,),
        in_specs=in_specs,
        out_specs=out_specs,
        out_shape=out_shape,
        compiler_params=pltpu.CompilerParams(
            dimension_semantics=("parallel",),
            vmem_limit_bytes=vmem_limit,
        ),
        cost_estimate=cost,
    )(*flat_inputs)

    if Bp != B:
        out, x1, x2, x3, x4 = (a[:B] for a in (out, x1, x2, x3, x4))
    return out, (x1, x2, x3, x4)


def init_params(key):
    """Deterministic init mimicking nn.Linear's U(-1/sqrt(in), 1/sqrt(in))."""
    dims = _DIMS
    params = {}
    for i in range(1, 6):
        fan_in, fan_out = dims[i - 1], dims[i]
        key, kw, kb = jax.random.split(key, 3)
        bound = 1.0 / jnp.sqrt(fan_in)
        params[f"w{i}"] = jax.random.uniform(
            kw, (fan_out, fan_in), jnp.float32, -bound, bound)  # PyTorch (out, in)
        params[f"b{i}"] = jax.random.uniform(
            kb, (fan_out,), jnp.float32, -bound, bound)
    return params


if __name__ == "__main__":
    key = jax.random.PRNGKey(0)
    kx, kp = jax.random.split(key)

    B = 8
    x = jax.random.normal(kx, (B, 784), jnp.float32)
    params = init_params(kp)

    out, (x1, x2, x3, x4) = simplenet_forward(x, params)
    jax.block_until_ready((out, x1, x2, x3, x4))

    # Pure-JAX f32 reference.  The kernel feeds the MXU bf16 operands and stores
    # bf16 activations, so use a correspondingly loose tolerance.
    def ref(x, p):
        h = x
        acts = []
        for i in range(1, 5):
            h = jax.nn.sigmoid(h @ p[f"w{i}"].T + p[f"b{i}"])
            acts.append(h)
        return h @ p["w5"].T + p["b5"], acts

    ro, racts = ref(x, params)
    assert out.shape == (B, 10), "bad output shape"
    assert out.dtype == jnp.float32, "bad output dtype"
    assert jnp.allclose(out, ro, atol=2e-2), "output mismatch"
    for a, r in zip((x1, x2, x3, x4), racts):
        assert a.shape == r.shape, "bad activation shape"
        assert jnp.allclose(a.astype(jnp.float32), r, atol=2e-2), "activation mismatch"

    print("KERNEL_OK")
</pallas_src>

<mosaic_0001>
module attributes {stable_mosaic.version = 11 : i64} {
  func.func @_simplenet_kernel(%arg0: i32, %arg1: memref<8x784xf32, #tpu.memory_space<vmem>>, %arg2: memref<784x32xbf16, #tpu.memory_space<vmem>>, %arg3: memref<1x32xf32, #tpu.memory_space<vmem>>, %arg4: memref<32x24xbf16, #tpu.memory_space<vmem>>, %arg5: memref<1x24xf32, #tpu.memory_space<vmem>>, %arg6: memref<24x18xbf16, #tpu.memory_space<vmem>>, %arg7: memref<1x18xf32, #tpu.memory_space<vmem>>, %arg8: memref<18x12xbf16, #tpu.memory_space<vmem>>, %arg9: memref<1x12xf32, #tpu.memory_space<vmem>>, %arg10: memref<12x10xbf16, #tpu.memory_space<vmem>>, %arg11: memref<1x10xf32, #tpu.memory_space<vmem>>, %arg12: memref<8x10xf32, #tpu.memory_space<vmem>>, %arg13: memref<8x32xbf16, #tpu.memory_space<vmem>>, %arg14: memref<8x24xbf16, #tpu.memory_space<vmem>>, %arg15: memref<8x18xbf16, #tpu.memory_space<vmem>>, %arg16: memref<8x12xbf16, #tpu.memory_space<vmem>>) attributes {dimension_semantics = [#tpu.dimension_semantics<parallel>], iteration_bounds = array<i64: 1>, scalar_prefetch = 0 : i64, scratch_operands = 0 : i64, tpu.core_type = #tpu.core_type<tc>, window_params = [{transform_indices = @transform_0, window_bounds = array<i64: 8, 784>}, {pipeline_mode = #tpu.pipeline_mode<synchronous>, transform_indices = @transform_1, window_bounds = array<i64: 784, 32>}, {pipeline_mode = #tpu.pipeline_mode<synchronous>, transform_indices = @transform_2, window_bounds = array<i64: 1, 32>}, {pipeline_mode = #tpu.pipeline_mode<synchronous>, transform_indices = @transform_3, window_bounds = array<i64: 32, 24>}, {pipeline_mode = #tpu.pipeline_mode<synchronous>, transform_indices = @transform_4, window_bounds = array<i64: 1, 24>}, {pipeline_mode = #tpu.pipeline_mode<synchronous>, transform_indices = @transform_5, window_bounds = array<i64: 24, 18>}, {pipeline_mode = #tpu.pipeline_mode<synchronous>, transform_indices = @transform_6, window_bounds = array<i64: 1, 18>}, {pipeline_mode = #tpu.pipeline_mode<synchronous>, transform_indices = @transform_7, window_bounds = array<i64: 18, 12>}, {pipeline_mode = #tpu.pipeline_mode<synchronous>, transform_indices = @transform_8, window_bounds = array<i64: 1, 12>}, {pipeline_mode = #tpu.pipeline_mode<synchronous>, transform_indices = @transform_9, window_bounds = array<i64: 12, 10>}, {pipeline_mode = #tpu.pipeline_mode<synchronous>, transform_indices = @transform_10, window_bounds = array<i64: 1, 10>}, {transform_indices = @transform_11, window_bounds = array<i64: 8, 10>}, {transform_indices = @transform_12, window_bounds = array<i64: 8, 32>}, {transform_indices = @transform_13, window_bounds = array<i64: 8, 24>}, {transform_indices = @transform_14, window_bounds = array<i64: 8, 18>}, {transform_indices = @transform_15, window_bounds = array<i64: 8, 12>}]} {
    %c0 = arith.constant 0 : index
    %c0_0 = arith.constant 0 : index
    %0 = vector.load %arg1[%c0, %c0_0] : memref<8x784xf32, #tpu.memory_space<vmem>>, vector<8x784xf32>
    %1 = arith.truncf %0 : vector<8x784xf32> to vector<8x784xbf16>
    %c0_1 = arith.constant 0 : index
    %c0_2 = arith.constant 0 : index
    %2 = vector.load %arg2[%c0_1, %c0_2] : memref<784x32xbf16, #tpu.memory_space<vmem>>, vector<784x32xbf16>
    %cst = arith.constant dense<0.000000e+00> : vector<8x32xf32>
    %3 = tpu.matmul %1, %2, %cst {dimension_numbers = #tpu.dot_dimension_numbers<[1], [0], [0], [1], [0, 0, 1, 1], [], []>} : vector<8x784xbf16>, vector<784x32xbf16>, vector<8x32xf32> -> vector<8x32xf32>
    %c0_3 = arith.constant 0 : index
    %c0_4 = arith.constant 0 : index
    %4 = vector.load %arg3[%c0_3, %c0_4] : memref<1x32xf32, #tpu.memory_space<vmem>>, vector<1x32xf32>
    %5 = vector.broadcast %4 : vector<1x32xf32> to vector<8x32xf32>
    %6 = arith.addf %3, %5 : vector<8x32xf32>
    %cst_5 = arith.constant 0.000000e+00 : f32
    %7 = vector.broadcast %cst_5 : f32 to vector<8x32xf32>
    %8 = arith.subf %7, %6 : vector<8x32xf32>
    %9 = math.exp %8 : vector<8x32xf32>
    %cst_6 = arith.constant 1.000000e+00 : f32
    %10 = vector.broadcast %cst_6 : f32 to vector<8x32xf32>
    %11 = arith.addf %10, %9 : vector<8x32xf32>
    %12 = tpu.reciprocal %11 {approx = true} : vector<8x32xf32> -> vector<8x32xf32>
    %13 = arith.truncf %12 : vector<8x32xf32> to vector<8x32xbf16>
    %c0_7 = arith.constant 0 : index
    %c0_8 = arith.constant 0 : index
    %14 = vector.load %arg4[%c0_7, %c0_8] : memref<32x24xbf16, #tpu.memory_space<vmem>>, vector<32x24xbf16>
    %cst_9 = arith.constant dense<0.000000e+00> : vector<8x24xf32>
    %15 = tpu.matmul %13, %14, %cst_9 {dimension_numbers = #tpu.dot_dimension_numbers<[1], [0], [0], [1], [0, 0, 1, 1], [], []>} : vector<8x32xbf16>, vector<32x24xbf16>, vector<8x24xf32> -> vector<8x24xf32>
    %c0_10 = arith.constant 0 : index
    %c0_11 = arith.constant 0 : index
    %16 = vector.load %arg5[%c0_10, %c0_11] : memref<1x24xf32, #tpu.memory_space<vmem>>, vector<1x24xf32>
    %17 = vector.broadcast %16 : vector<1x24xf32> to vector<8x24xf32>
    %18 = arith.addf %15, %17 : vector<8x24xf32>
    %cst_12 = arith.constant 0.000000e+00 : f32
    %19 = vector.broadcast %cst_12 : f32 to vector<8x24xf32>
    %20 = arith.subf %19, %18 : vector<8x24xf32>
    %21 = math.exp %20 : vector<8x24xf32>
    %cst_13 = arith.constant 1.000000e+00 : f32
    %22 = vector.broadcast %cst_13 : f32 to vector<8x24xf32>
    %23 = arith.addf %22, %21 : vector<8x24xf32>
    %24 = tpu.reciprocal %23 {approx = true} : vector<8x24xf32> -> vector<8x24xf32>
    %25 = arith.truncf %24 : vector<8x24xf32> to vector<8x24xbf16>
    %c0_14 = arith.constant 0 : index
    %c0_15 = arith.constant 0 : index
    %26 = vector.load %arg6[%c0_14, %c0_15] : memref<24x18xbf16, #tpu.memory_space<vmem>>, vector<24x18xbf16>
    %cst_16 = arith.constant dense<0.000000e+00> : vector<8x18xf32>
    %27 = tpu.matmul %25, %26, %cst_16 {dimension_numbers = #tpu.dot_dimension_numbers<[1], [0], [0], [1], [0, 0, 1, 1], [], []>} : vector<8x24xbf16>, vector<24x18xbf16>, vector<8x18xf32> -> vector<8x18xf32>
    %c0_17 = arith.constant 0 : index
    %c0_18 = arith.constant 0 : index
    %28 = vector.load %arg7[%c0_17, %c0_18] : memref<1x18xf32, #tpu.memory_space<vmem>>, vector<1x18xf32>
    %29 = vector.broadcast %28 : vector<1x18xf32> to vector<8x18xf32>
    %30 = arith.addf %27, %29 : vector<8x18xf32>
    %cst_19 = arith.constant 0.000000e+00 : f32
    %31 = vector.broadcast %cst_19 : f32 to vector<8x18xf32>
    %32 = arith.subf %31, %30 : vector<8x18xf32>
    %33 = math.exp %32 : vector<8x18xf32>
    %cst_20 = arith.constant 1.000000e+00 : f32
    %34 = vector.broadcast %cst_20 : f32 to vector<8x18xf32>
    %35 = arith.addf %34, %33 : vector<8x18xf32>
    %36 = tpu.reciprocal %35 {approx = true} : vector<8x18xf32> -> vector<8x18xf32>
    %37 = arith.truncf %36 : vector<8x18xf32> to vector<8x18xbf16>
    %c0_21 = arith.constant 0 : index
    %c0_22 = arith.constant 0 : index
    %38 = vector.load %arg8[%c0_21, %c0_22] : memref<18x12xbf16, #tpu.memory_space<vmem>>, vector<18x12xbf16>
    %cst_23 = arith.constant dense<0.000000e+00> : vector<8x12xf32>
    %39 = tpu.matmul %37, %38, %cst_23 {dimension_numbers = #tpu.dot_dimension_numbers<[1], [0], [0], [1], [0, 0, 1, 1], [], []>} : vector<8x18xbf16>, vector<18x12xbf16>, vector<8x12xf32> -> vector<8x12xf32>
    %c0_24 = arith.constant 0 : index
    %c0_25 = arith.constant 0 : index
    %40 = vector.load %arg9[%c0_24, %c0_25] : memref<1x12xf32, #tpu.memory_space<vmem>>, vector<1x12xf32>
    %41 = vector.broadcast %40 : vector<1x12xf32> to vector<8x12xf32>
    %42 = arith.addf %39, %41 : vector<8x12xf32>
    %cst_26 = arith.constant 0.000000e+00 : f32
    %43 = vector.broadcast %cst_26 : f32 to vector<8x12xf32>
    %44 = arith.subf %43, %42 : vector<8x12xf32>
    %45 = math.exp %44 : vector<8x12xf32>
    %cst_27 = arith.constant 1.000000e+00 : f32
    %46 = vector.broadcast %cst_27 : f32 to vector<8x12xf32>
    %47 = arith.addf %46, %45 : vector<8x12xf32>
    %48 = tpu.reciprocal %47 {approx = true} : vector<8x12xf32> -> vector<8x12xf32>
    %49 = arith.truncf %48 : vector<8x12xf32> to vector<8x12xbf16>
    %c0_28 = arith.constant 0 : index
    %c0_29 = arith.constant 0 : index
    %50 = vector.load %arg10[%c0_28, %c0_29] : memref<12x10xbf16, #tpu.memory_space<vmem>>, vector<12x10xbf16>
    %cst_30 = arith.constant dense<0.000000e+00> : vector<8x10xf32>
    %51 = tpu.matmul %49, %50, %cst_30 {dimension_numbers = #tpu.dot_dimension_numbers<[1], [0], [0], [1], [0, 0, 1, 1], [], []>} : vector<8x12xbf16>, vector<12x10xbf16>, vector<8x10xf32> -> vector<8x10xf32>
    %c0_31 = arith.constant 0 : index
    %c0_32 = arith.constant 0 : index
    %52 = vector.load %arg11[%c0_31, %c0_32] : memref<1x10xf32, #tpu.memory_space<vmem>>, vector<1x10xf32>
    %53 = vector.broadcast %52 : vector<1x10xf32> to vector<8x10xf32>
    %54 = arith.addf %51, %53 : vector<8x10xf32>
    %c0_33 = arith.constant 0 : index
    %c0_34 = arith.constant 0 : index
    %55 = vector.load %arg12[%c0_33, %c0_34] : memref<8x10xf32, #tpu.memory_space<vmem>>, vector<8x10xf32>
    tpu.vector_store %arg12[%c0_33, %c0_34], %54 {strides = array<i32>} : memref<8x10xf32, #tpu.memory_space<vmem>>, vector<8x10xf32>,
    %56 = arith.truncf %12 : vector<8x32xf32> to vector<8x32xbf16>
    %c0_35 = arith.constant 0 : index
    %c0_36 = arith.constant 0 : index
    %57 = vector.load %arg13[%c0_35, %c0_36] : memref<8x32xbf16, #tpu.memory_space<vmem>>, vector<8x32xbf16>
    tpu.vector_store %arg13[%c0_35, %c0_36], %56 {strides = array<i32>} : memref<8x32xbf16, #tpu.memory_space<vmem>>, vector<8x32xbf16>,
    %58 = arith.truncf %24 : vector<8x24xf32> to vector<8x24xbf16>
    %c0_37 = arith.constant 0 : index
    %c0_38 = arith.constant 0 : index
    %59 = vector.load %arg14[%c0_37, %c0_38] : memref<8x24xbf16, #tpu.memory_space<vmem>>, vector<8x24xbf16>
    tpu.vector_store %arg14[%c0_37, %c0_38], %58 {strides = array<i32>} : memref<8x24xbf16, #tpu.memory_space<vmem>>, vector<8x24xbf16>,
    %60 = arith.truncf %36 : vector<8x18xf32> to vector<8x18xbf16>
    %c0_39 = arith.constant 0 : index
    %c0_40 = arith.constant 0 : index
    %61 = vector.load %arg15[%c0_39, %c0_40] : memref<8x18xbf16, #tpu.memory_space<vmem>>, vector<8x18xbf16>
    tpu.vector_store %arg15[%c0_39, %c0_40], %60 {strides = array<i32>} : memref<8x18xbf16, #tpu.memory_space<vmem>>, vector<8x18xbf16>,
    %62 = arith.truncf %48 : vector<8x12xf32> to vector<8x12xbf16>
    %c0_41 = arith.constant 0 : index
    %c0_42 = arith.constant 0 : index
    %63 = vector.load %arg16[%c0_41, %c0_42] : memref<8x12xbf16, #tpu.memory_space<vmem>>, vector<8x12xbf16>
    tpu.vector_store %arg16[%c0_41, %c0_42], %62 {strides = array<i32>} : memref<8x12xbf16, #tpu.memory_space<vmem>>, vector<8x12xbf16>,
    return
  }
  func.func @transform_0(%arg0: i32) -> (i32, i32) {
    %c0_i32 = arith.constant 0 : i32
    %c0_i32_0 = arith.constant 0 : i32
    return %arg0, %c0_i32 : i32, i32
  }
  func.func @transform_1(%arg0: i32) -> (i32, i32) {
    %c0_i32 = arith.constant 0 : i32
    %c0_i32_0 = arith.constant 0 : i32
    %c0_i32_1 = arith.constant 0 : i32
    return %c0_i32, %c0_i32_0 : i32, i32
  }
  func.func @transform_2(%arg0: i32) -> (i32, i32) {
    %c0_i32 = arith.constant 0 : i32
    %c0_i32_0 = arith.constant 0 : i32
    %c0_i32_1 = arith.constant 0 : i32
    return %c0_i32, %c0_i32_0 : i32, i32
  }
  func.func @transform_3(%arg0: i32) -> (i32, i32) {
    %c0_i32 = arith.constant 0 : i32
    %c0_i32_0 = arith.constant 0 : i32
    %c0_i32_1 = arith.constant 0 : i32
    return %c0_i32, %c0_i32_0 : i32, i32
  }
  func.func @transform_4(%arg0: i32) -> (i32, i32) {
    %c0_i32 = arith.constant 0 : i32
    %c0_i32_0 = arith.constant 0 : i32
    %c0_i32_1 = arith.constant 0 : i32
    return %c0_i32, %c0_i32_0 : i32, i32
  }
  func.func @transform_5(%arg0: i32) -> (i32, i32) {
    %c0_i32 = arith.constant 0 : i32
    %c0_i32_0 = arith.constant 0 : i32
    %c0_i32_1 = arith.constant 0 : i32
    return %c0_i32, %c0_i32_0 : i32, i32
  }
  func.func @transform_6(%arg0: i32) -> (i32, i32) {
    %c0_i32 = arith.constant 0 : i32
    %c0_i32_0 = arith.constant 0 : i32
    %c0_i32_1 = arith.constant 0 : i32
    return %c0_i32, %c0_i32_0 : i32, i32
  }
  func.func @transform_7(%arg0: i32) -> (i32, i32) {
    %c0_i32 = arith.constant 0 : i32
    %c0_i32_0 = arith.constant 0 : i32
    %c0_i32_1 = arith.constant 0 : i32
    return %c0_i32, %c0_i32_0 : i32, i32
  }
  func.func @transform_8(%arg0: i32) -> (i32, i32) {
    %c0_i32 = arith.constant 0 : i32
    %c0_i32_0 = arith.constant 0 : i32
    %c0_i32_1 = arith.constant 0 : i32
    return %c0_i32, %c0_i32_0 : i32, i32
  }
  func.func @transform_9(%arg0: i32) -> (i32, i32) {
    %c0_i32 = arith.constant 0 : i32
    %c0_i32_0 = arith.constant 0 : i32
    %c0_i32_1 = arith.constant 0 : i32
    return %c0_i32, %c0_i32_0 : i32, i32
  }
  func.func @transform_10(%arg0: i32) -> (i32, i32) {
    %c0_i32 = arith.constant 0 : i32
    %c0_i32_0 = arith.constant 0 : i32
    %c0_i32_1 = arith.constant 0 : i32
    return %c0_i32, %c0_i32_0 : i32, i32
  }
  func.func @transform_11(%arg0: i32) -> (i32, i32) {
    %c0_i32 = arith.constant 0 : i32
    %c0_i32_0 = arith.constant 0 : i32
    return %arg0, %c0_i32 : i32, i32
  }
  func.func @transform_12(%arg0: i32) -> (i32, i32) {
    %c0_i32 = arith.constant 0 : i32
    %c0_i32_0 = arith.constant 0 : i32
    return %arg0, %c0_i32 : i32, i32
  }
  func.func @transform_13(%arg0: i32) -> (i32, i32) {
    %c0_i32 = arith.constant 0 : i32
    %c0_i32_0 = arith.constant 0 : i32
    return %arg0, %c0_i32 : i32, i32
  }
  func.func @transform_14(%arg0: i32) -> (i32, i32) {
    %c0_i32 = arith.constant 0 : i32
    %c0_i32_0 = arith.constant 0 : i32
    return %arg0, %c0_i32 : i32, i32
  }
  func.func @transform_15(%arg0: i32) -> (i32, i32) {
    %c0_i32 = arith.constant 0 : i32
    %c0_i32_0 = arith.constant 0 : i32
    return %arg0, %c0_i32 : i32, i32
  }
}

</mosaic_0001>

<bundles_post_ra>
// kernel: simplenet_forward.1
= control target key start
LH: loop header
LB: loop body
LE: loop exit
PB: predicated region body
PF: predicated region fallthrough
CT: control target
= control target key end

     0   :  { %21 = vsyncpa [#allocation3], 0  ;;  %s1541_s0 = inlined_call_operand.vmem [shape: f32[8,784], index: 0, kind: input, shape index: {}]   ;;  %s1542_s1 = inlined_call_operand.vmem [shape: bf16[784,32], index: 1, kind: input, shape index: {}]   ;;  %s1543_s2 = inlined_call_operand.vmem [shape: f32[1,32], index: 2, kind: input, shape index: {}]   ;;  %s1544_s3 = inlined_call_operand.vmem [shape: bf16[32,24], index: 3, kind: input, shape index: {}]   ;;  %s1545_s4 = inlined_call_operand.vmem [shape: f32[1,24], index: 4, kind: input, shape index: {}]   ;;  %s1546_s5 = inlined_call_operand.vmem [shape: bf16[24,18], index: 5, kind: input, shape index: {}]   ;;  %s1547_s6 = inlined_call_operand.vmem [shape: f32[1,18], index: 6, kind: input, shape index: {}]   ;;  %s1548_s7 = inlined_call_operand.vmem [shape: bf16[18,12], index: 7, kind: input, shape index: {}]   ;;  %s1549_s8 = inlined_call_operand.vmem [shape: f32[1,12], index: 8, kind: input, shape index: {}]   ;;  %s1550_s9 = inlined_call_operand.vmem [shape: bf16[12,10], index: 9, kind: input, shape index: {}]   ;;  %s1551_s10 = inlined_call_operand.vmem [shape: f32[1,10], index: 10, kind: input, shape index: {}]   ;;  %s1552_s11 = inlined_call_operand.hbm [shape: f32[8,10], index: 11, kind: output, shape index: {0}]   ;;  %s1553_s12 = inlined_call_operand.hbm [shape: bf16[8,32], index: 12, kind: output, shape index: {1}]   ;;  %s1554_s13 = inlined_call_operand.hbm [shape: bf16[8,24], index: 13, kind: output, shape index: {2}]   ;;  %s1555_s14 = inlined_call_operand.hbm [shape: bf16[8,18], index: 14, kind: output, shape index: {3}]   ;;  %s1556_s15 = inlined_call_operand.hbm [shape: bf16[8,12], index: 15, kind: output, shape index: {4}]  }
   0x1   :  { %22 = vsyncpa [#allocation5], 0  ;;  %v1035_v0 = vld [vmem:[%s1542_s1 + $0x38] sm:$0xff]  ;;  %v1034_v3 = vld [vmem:[%s1542_s1 + $0x30] sm:$0xff] }
   0x2   :  { %v1043_v1 = vld [vmem:[%s1542_s1 + $0x78] sm:$0xff]  ;;  %461 = vmatpush.bf16.msra.mxu0 %v1035_v0  ;;  %v1042_v4 = vld [vmem:[%s1542_s1 + $0x70] sm:$0xff]  ;;  %v1033_v8 = vld [vmem:[%s1542_s1 + $0x28] sm:$0xff] }
   0x3   :  { %v1051_v2 = vld [vmem:[%s1542_s1 + $0xb8] sm:$0xff]  ;;  %474 = vmatpush.bf16.msra.mxu1 %v1043_v1  ;;  %v1050_v5 = vld [vmem:[%s1542_s1 + $0xb0] sm:$0xff]  ;;  %v1041_v9 = vld [vmem:[%s1542_s1 + $0x68] sm:$0xff] }
   0x4   :  { %487 = vmatpush.bf16.msra.mxu2 %v1051_v2  ;;  %v1059_v6 = vld [vmem:[%s1542_s1 + $0xf8] sm:$0xff]  ;;  %v1058_v7 = vld [vmem:[%s1542_s1 + $0xf0] sm:$0xff]  ;;  %v1049_v10 = vld [vmem:[%s1542_s1 + $0xa8] sm:$0xff] }
   0x5   :  { %500 = vmatpush.bf16.msra.mxu3 %v1059_v6  ;;  %v1057_v11 = vld [vmem:[%s1542_s1 + $0xe8] sm:$0xff]  ;;  %v1032_v12 = vld [vmem:[%s1542_s1 + $0x20] sm:$0xff]  ;;  %v1031_v16 = vld [vmem:[%s1542_s1 + $0x18] sm:$0xff] }
   0x6   :  { %462 = vmatpush.bf16.msra.mxu0 %v1034_v3  ;;  %v1040_v13 = vld [vmem:[%s1542_s1 + $0x60] sm:$0xff]  ;;  %v1039_v17 = vld [vmem:[%s1542_s1 + $0x58] sm:$0xff]  ;;  %v1030_v19 = vld [vmem:[%s1542_s1 + $0x10] sm:$0xff] }
   0x7   :  { %475 = vmatpush.bf16.msra.mxu1 %v1042_v4  ;;  %v1048_v14 = vld [vmem:[%s1542_s1 + $0xa0] sm:$0xff]  ;;  %v1047_v18 = vld [vmem:[%s1542_s1 + $0x98] sm:$0xff]  ;;  %v1038_v21 = vld [vmem:[%s1542_s1 + $0x50] sm:$0xff] }
   0x8   :  { %488 = vmatpush.bf16.msra.mxu2 %v1050_v5  ;;  %v1056_v15 = vld [vmem:[%s1542_s1 + $0xe0] sm:$0xff]  ;;  %v1055_v20 = vld [vmem:[%s1542_s1 + $0xd8] sm:$0xff] }
   0x9   :  { %501 = vmatpush.bf16.msra.mxu3 %v1058_v7 }
   0xa   :  { %463 = vmatpush.bf16.msra.mxu0 %v1033_v8 }
   0xb   :  { %476 = vmatpush.bf16.msra.mxu1 %v1041_v9 }
   0xc   :  { %489 = vmatpush.bf16.msra.mxu2 %v1049_v10 }
   0xd   :  { %502 = vmatpush.bf16.msra.mxu3 %v1057_v11 }
   0xe   :  { %464 = vmatpush.bf16.msra.mxu0 %v1032_v12 }
   0xf   :  { %477 = vmatpush.bf16.msra.mxu1 %v1040_v13 }
  0x10   :  { %490 = vmatpush.bf16.msra.mxu2 %v1048_v14 }
  0x11   :  { %503 = vmatpush.bf16.msra.mxu3 %v1056_v15 }
  0x12   :  { %465 = vmatpush.bf16.msra.mxu0 %v1031_v16 }
  0x13   :  { %478 = vmatpush.bf16.msra.mxu1 %v1039_v17 }
  0x14   :  { %23 = vsyncpa [#allocation8], 0  ;;  %491 = vmatpush.bf16.msra.mxu2 %v1047_v18  ;;  %v1046_v22 = vld [vmem:[%s1542_s1 + $0x90] sm:$0xff]  ;;  %v1029_v24 = vld [vmem:[%s1542_s1 + $0x8] sm:$0xff]  ;;  %vm457_vm0 = vcmask 130048   ;;  %vm578_vm1 = vcmask 261120  }
  0x15   :  { %504 = vmatpush.bf16.msra.mxu3 %v1055_v20  ;;  %v1054_v23 = vld [vmem:[%s1542_s1 + $0xd0] sm:$0xff]  ;;  %v1037_v25 = vld [vmem:[%s1542_s1 + $0x48] sm:$0xff]  ;;  %v1028_v27 = vld [vmem:[%s1542_s1] sm:$0xff]  ;;  %vm721_vm2 = vcmask 257024   ;;  %vm621_vm3 = vcmask 1043456   ;;  %vm617_vm4 = vcmask 195584  }
  0x16   :  { %466 = vmatpush.bf16.msra.mxu0 %v1030_v19  ;;  %v1045_v26 = vld [vmem:[%s1542_s1 + $0x88] sm:$0xff]  ;;  %v1036_v29 = vld [vmem:[%s1542_s1 + $0x40] sm:$0xff]  ;;  %v1067_v32 = vld [vmem:[%s1542_s1 + $0x138] sm:$0xff]  ;;  %vm723_vm5 = vcmask 191488   ;;  %vm664_vm6 = vcmask 1040384   ;;  %vm660_vm7 = vcmask 146432  }
  0x17   :  { %479 = vmatpush.bf16.msra.mxu1 %v1038_v21  ;;  %v1053_v28 = vld [vmem:[%s1542_s1 + $0xc8] sm:$0xff]  ;;  %v47_v30 = vld [vmem:[%s1541_s0] sm:$0xff]  ;;  %v1075_v33 = vld [vmem:[%s1542_s1 + $0x178] sm:$0xff]  ;;  %vm725_vm8 = vcmask 142336   ;;  %vm702_vm9 = vcmask 1045504   ;;  %vm698_vm10 = vcmask 97280  }
  0x18   :  { %492 = vmatpush.bf16.msra.mxu2 %v1046_v22  ;;  %v48_v31 = vld [vmem:[%s1541_s0 + $0x8] sm:$0xff]  ;;  %v1044_v34 = vld [vmem:[%s1542_s1 + $0x80] sm:$0xff]  ;;  %v49_v35 = vld [vmem:[%s1541_s0 + $0x10] sm:$0xff]  ;;  %v54_v36 = vpack.c.bf16 %v47_v30, %v47_v30  ;;  %vm727_vm11 = vcmask 93184   ;;  %s747_s26 = sshll.u32 %s1553_s12, 4  ;;  %s769_s29 = sshll.u32 %s1555_s14, 4  ;;  %s748_s26 = int_to_ptr.hbm [resolvable:$true] %s747_s26  ;;  %s770_s29 = int_to_ptr.hbm [resolvable:$true] %s769_s29 }
  0x19   :  { %505 = vmatpush.bf16.msra.mxu3 %v1054_v23  ;;  %v55_v37 = vpack.c.bf16 %v48_v31, %v48_v31  ;;  %v1052_v38 = vld [vmem:[%s1542_s1 + $0xc0] sm:$0xff]  ;;  %v50_v40 = vld [vmem:[%s1541_s0 + $0x18] sm:$0xff]  ;;  %v1066_v41 = vld [vmem:[%s1542_s1 + $0x130] sm:$0xff]  ;;  %v56_v43 = vpack.c.bf16 %v49_v35, %v49_v35  ;;  %s1236_s30 = smov [#allocation6]   ;;  %s780_s19 = sshll.u32 %s1556_s15, 4  ;;  %vm719_vm12 = vcmask 80896   ;;  %s781_s19 = int_to_ptr.hbm [resolvable:$true] %s780_s19 }
  0x1a   :  { %467 = vmatpush.bf16.msra.mxu0 %v1029_v24  ;;  %v1076_v39 = vld [vmem:[%s1542_s1 + $0x180] sm:$0xff]  ;;  %v1074_v42 = vld [vmem:[%s1542_s1 + $0x170] sm:$0xff]  ;;  %v57_v44 = vpack.c.bf16 %v50_v40, %v50_v40  ;;  %v1065_v45 = vld [vmem:[%s1542_s1 + $0x128] sm:$0xff]  ;;  %s756_s16 = sshll.u32 %s1236_s30, 4  ;;  %s1237_s20 = smov [#allocation9]   ;;  %s757_s16 = int_to_ptr.vmem [resolvable:$true] %s756_s16 }
  0x1b   :  { %480 = vmatpush.bf16.msra.mxu1 %v1037_v25  ;;  %v1073_v46 = vld [vmem:[%s1542_s1 + $0x168] sm:$0xff]  ;;  %v1064_v47 = vld [vmem:[%s1542_s1 + $0x120] sm:$0xff]  ;;  %v1063_v49 = vld [vmem:[%s1542_s1 + $0x118] sm:$0xff]  ;;  %s778_s21 = sshll.u32 %s1237_s20, 4  ;;  %s1238_s22 = smov [#allocation2]   ;;  %s779_s21 = int_to_ptr.vmem [resolvable:$true] %s778_s21 }
  0x1c   :  { %493 = vmatpush.bf16.msra.mxu2 %v1045_v26  ;;  %v1072_v48 = vld [vmem:[%s1542_s1 + $0x160] sm:$0xff]  ;;  %v1071_v50 = vld [vmem:[%s1542_s1 + $0x158] sm:$0xff]  ;;  %v53_v51 = vld [vmem:[%s1541_s0 + $0x30] sm:$0xff]  ;;  %s736_s24 = sshll.u32 %s1552_s11, 4  ;;  %s737_s24 = int_to_ptr.hbm [resolvable:$true] %s736_s24 }
  0x1d   :  { %506 = vmatpush.bf16.msra.mxu3 %v1053_v28  ;;  %v1062_v52 = vld [vmem:[%s1542_s1 + $0x110] sm:$0xff]  ;;  %v60_v54 = vpack.c.bf16 %v53_v51, %v53_v51  ;;  %v1061_v55 = vld [vmem:[%s1542_s1 + $0x108] sm:$0xff]  ;;  %v1060_v57 = vld [vmem:[%s1542_s1 + $0x100] sm:$0xff] }
  0x1e   :  { %468 = vmatpush.bf16.msra.mxu0 %v1028_v27  ;;  %v1070_v53 = vld [vmem:[%s1542_s1 + $0x150] sm:$0xff]  ;;  %v1069_v56 = vld [vmem:[%s1542_s1 + $0x148] sm:$0xff]  ;;  %v1068_v58 = vld [vmem:[%s1542_s1 + $0x140] sm:$0xff] }
  0x1f   :  { %481 = vmatpush.bf16.msra.mxu1 %v1036_v29  ;;  %v51_v59 = vld [vmem:[%s1541_s0 + $0x20] sm:$0xff]  ;;  %v52_v60 = vld [vmem:[%s1541_s0 + $0x28] sm:$0xff]  ;;  %s1234_s0 = smov [#allocation4]  }
  0x20   :  { %494 = vmatpush.bf16.msra.mxu2 %v1044_v34  ;;  %v58_v61 = vpack.c.bf16 %v51_v59, %v51_v59  ;;  %v59_v62 = vpack.c.bf16 %v52_v60, %v52_v60  ;;  %v1087_v5 = vld [vmem:[%s1543_s2] ss:$0 sm:$0xff]  ;;  %v1078_v8 = vld [vmem:[%s1544_s3 + $0x8] sm:$0xff]  ;;  %v1081_v60 = vld [vmem:[%s1550_s9] sm:$0x30]  ;;  %s745_s27 = sshll.u32 %s1234_s0, 4  ;;  %s746_s27 = int_to_ptr.vmem [resolvable:$true] %s745_s27 }
  0x21   :  { %469 = vmatmul.bf16.vlgmr.msra.gmra.mxu0 %v54_v36  ;;  %507 = vmatpush.bf16.msra.mxu3 %v1052_v38  ;;  %v1077_v10 = vld [vmem:[%s1544_s3] sm:$0xff]  ;;  %v603_v29 = vld [vmem:[%s1546_s5 + $0x8] sm:$0xf] }
  0x22   :  { %513 = vmatpush.bf16.msrb.mxu0 %v1067_v32  ;;  %482 = vmatmul.bf16.vlgmr.msra.gmra.mxu1 %v55_v37  ;;  %v613_v30 = vunpack.c.l.b16 %v603_v29  ;;  %v1088_v34 = vld [vmem:[%s1545_s4] ss:$0 sm:$0xff] }
  0x23   :  { %526 = vmatpush.bf16.msrb.mxu1 %v1075_v33  ;;  %495 = vmatmul.bf16.vlgmr.msra.gmra.mxu2 %v56_v43  ;;  %v1079_v33 = vld [vmem:[%s1546_s5] sm:$0xff]  ;;  %s758_s5 = sshll.u32 %s1554_s13, 4  ;;  %s759_s5 = int_to_ptr.hbm [resolvable:$true] %s758_s5 }
  0x24   :  { %546 = vmatpush.bf16.msrb.mxu2 %v1076_v39  ;;  %508 = vmatmul.bf16.vlgmr.msra.gmra.mxu3 %v57_v44  ;;  %v615_v31 = vpack.c.b16 %v613_v30, %v613_v30  ;;  %v646_v44 = vld [vmem:[%s1548_s7 + $0x8] sm:$0x1]  ;;  %v1025_v59 = vld [vmem:[%s1550_s9] sm:$0xf] }
  0x25   :  { %588 = vmatpush.bf16.msrb.mxu3 %v1078_v8 }
  0x26   :  { %514 = vmatpush.bf16.msrb.mxu0 %v1066_v41  ;;  %v623_v32 = vsel %vm621_vm3, %v615_v31, 0 }
  0x27   :  { %527 = vmatpush.bf16.msrb.mxu1 %v1074_v42 }
  0x28   :  { %631 = vmatpush.bf16.msra.mxu2 %v623_v32 }
  0x29   :  { %589 = vmatpush.bf16.msrb.mxu3 %v1077_v10 }
  0x2a   :  { %515 = vmatpush.bf16.msrb.mxu0 %v1065_v45  ;;  %v656_v45 = vunpack.c.l.b16 %v646_v44 }
  0x2b   :  { %528 = vmatpush.bf16.msrb.mxu1 %v1073_v46 }
  0x2c   :  { %632 = vmatpush.bf16.msra.mxu2 %v1079_v33  ;;  %v658_v46 = vpack.c.b16 %v656_v45, %v656_v45 }
  0x2e   :  { %516 = vmatpush.bf16.msrb.mxu0 %v1064_v47  ;;  %v666_v47 = vsel %vm664_vm6, %v658_v46, 0 }
  0x2f   :  { %529 = vmatpush.bf16.msrb.mxu1 %v1072_v48  ;;  %674 = vmatpush.bf16.msra.mxu3 %v666_v47  ;;  %v1080_v48 = vld [vmem:[%s1548_s7] sm:$0xff] }
  0x32   :  { %517 = vmatpush.bf16.msrb.mxu0 %v1063_v49  ;;  %v1089_v49 = vld [vmem:[%s1547_s6] ss:$0 sm:$0xff]  ;;  %s734_s6 = sshll.u32 %s1238_s22, 4  ;;  %s735_s6 = int_to_ptr.vmem [resolvable:$true] %s734_s6 }
  0x33   :  { %530 = vmatpush.bf16.msrb.mxu1 %v1071_v50  ;;  %1003 = vmatmul.msk.bf16.vlgmr.msrb.gmra.mxu2 %vm457_vm0, %v60_v54 }
  0x34   :  { %675 = vmatpush.bf16.msra.mxu3 %v1080_v48 }
  0x36   :  { %518 = vmatpush.bf16.msrb.mxu0 %v1062_v52 }
  0x37   :  { %531 = vmatpush.bf16.msrb.mxu1 %v1070_v53 }
  0x3a   :  { %519 = vmatpush.bf16.msrb.mxu0 %v1061_v55 }
  0x3b   :  { %532 = vmatpush.bf16.msrb.mxu1 %v1069_v56 }
  0x3e   :  { %520 = vmatpush.bf16.msrb.mxu0 %v1060_v57 }
  0x3f   :  { %533 = vmatpush.bf16.msrb.mxu1 %v1068_v58 }
  0x41   :  { %521 = vmatmul.bf16.vlgmr.msrb.gmra.mxu0 %v58_v61  ;;  %v1026_v61 = vor.u32 %v1081_v60, %v1025_v59 }
  0x42   :  { %534 = vmatmul.bf16.vlgmr.msrb.gmra.mxu1 %v59_v62 }
  0x43   :  { %v704_v62 = vsel %vm702_vm9, %v1026_v61, 0 }
  0x44   :  { %713 = vmatpush.bf16.msra.mxu0 %v704_v62 }
  0x9e   :  { %v470_v63 = vpop.f32.mrf.mxu0 }
  0x9f   :  { %v483_v0 = vpop.f32.mrf.mxu1  ;;  %v471_v6 = vadd.f32 %v1087_v5, %v470_v63  ;;  %v1090_v63 = vld [vmem:[%s1549_s8] ss:$0 sm:$0xff]  ;;  %s1235_s8 = smov [#allocation7]  }
  0xa0   :  { %s767_s28 = sshll.u32 %s1235_s8, 4  ;;  %s768_s28 = int_to_ptr.vmem [resolvable:$true] %s767_s28 }
  0xa1   :  { %v484_v11 = vadd.f32 %v483_v0, %v471_v6 }
  0xa6   :  { %v472_v1 = vpop.f32.mrf.mxu0  ;;  %v496_v3 = vpop.f32.mrf.mxu2 }
  0xa7   :  { %v485_v2 = vpop.f32.mrf.mxu1  ;;  %v509_v4 = vpop.f32.mrf.mxu3  ;;  %v497_v12 = vadd.f32 %v496_v3, %v484_v11 }
  0xa9   :  { %v510_v14 = vadd.f32 %v509_v4, %v497_v12 }
  0xae   :  { %v498_v7 = vpop.f32.mrf.mxu2 }
  0xaf   :  { %v511_v9 = vpop.f32.mrf.mxu3 }
  0xb0   :  { %v1091_v9 = vld [vmem:[%s1551_s10] ss:$0 sm:$0xff] }
  0xb6   :  { %v548_v13 = vpop.f32.mrf.mxu2 }
  0xbe   :  { %v522_v15 = vpop.f32.mrf.mxu0  ;;  %v550_v19 = vpop.f32.mrf.mxu2 }
  0xbf   :  { %v535_v16 = vpop.f32.mrf.mxu1  ;;  %v523_v17 = vadd.f32 %v522_v15, %v510_v14 }
  0xc1   :  { %v536_v18 = vadd.f32 %v535_v16, %v523_v17 }
  0xc3   :  { %v549_v20 = vadd.f32 %v548_v13, %v536_v18 }
  0xc5   :  { %v552_v21 = vsub.f32 0.0, %v549_v20 }
  0xc6   :  { %v524_v22 = vpop.f32.mrf.mxu0 }
  0xc7   :  { %v537_v23 = vpop.f32.mrf.mxu1  ;;  %v553_v24 = vmul.f32 1.442695, %v552_v21 }
  0xc9   :  { %1092 = vpow2.f32 %v553_v24 }
  0xcf   :  { %v1093_v25 = vpop.eup %1092 }
  0xd0   :  { %v555_v26 = vadd.f32 1.0, %v1093_v25 }
  0xd2   :  { %1094 = vrcp.f32 %v555_v26 }
  0xd8   :  { %v1095_v27 = vpop.eup %1094 }
  0xd9   :  { %v557_v28 = vpack.c.bf16 %v1095_v27, %v1095_v27 }
  0xdb   :  { %1012 = vmatmul.msk.bf16.vlgmr.msrb.gmra.mxu3 %vm578_vm1, %v557_v28  ;;  %722 = vst.msk [vmem:[#allocation4] sm:$0xf] %vm721_vm2, %v557_v28 }
  0xdc   :  { %750 = dma.vmem_to_hbm [thread:$0]  %s746_s27, 64, %s748_s26, [#allocation5]  }
 0x15e   :  { %v591_v35 = vpop.f32.mrf.mxu3 }
 0x15f   :  { %v592_v36 = vadd.f32 %v1088_v34, %v591_v35 }
 0x161   :  { %v595_v37 = vsub.f32 0.0, %v592_v36 }
 0x163   :  { %v596_v38 = vmul.f32 1.442695, %v595_v37 }
 0x165   :  { %1096 = vpow2.f32 %v596_v38 }
 0x166   :  { %v593_v39 = vpop.f32.mrf.mxu3 }
 0x16b   :  { %v1097_v40 = vpop.eup %1096 }
 0x16c   :  { %v598_v41 = vadd.f32 1.0, %v1097_v40 }
 0x16e   :  { %1098 = vrcp.f32 %v598_v41 }
 0x174   :  { %v1099_v42 = vpop.eup %1098 }
 0x175   :  { %v600_v43 = vpack.c.bf16 %v1099_v42, %v1099_v42 }
 0x177   :  { %1017 = vmatmul.msk.bf16.vlgmr.msra.gmra.mxu2 %vm617_vm4, %v600_v43  ;;  %724 = vst.msk [vmem:[#allocation6] sm:$0xf] %vm723_vm5, %v600_v43 }
 0x178   :  { %761 = dma.vmem_to_hbm [thread:$0]  %s757_s16, 64, %s759_s5, [#allocation5]  }
 0x1fa   :  { %v634_v50 = vpop.f32.mrf.mxu2 }
 0x1fb   :  { %v635_v51 = vadd.f32 %v1089_v49, %v634_v50 }
 0x1fd   :  { %v638_v52 = vsub.f32 0.0, %v635_v51 }
 0x1ff   :  { %v639_v53 = vmul.f32 1.442695, %v638_v52 }
 0x201   :  { %1100 = vpow2.f32 %v639_v53 }
 0x202   :  { %v636_v54 = vpop.f32.mrf.mxu2 }
 0x207   :  { %v1101_v55 = vpop.eup %1100 }
 0x208   :  { %v641_v56 = vadd.f32 1.0, %v1101_v55 }
 0x20a   :  { %1102 = vrcp.f32 %v641_v56 }
 0x210   :  { %v1103_v57 = vpop.eup %1102 }
 0x211   :  { %v643_v58 = vpack.c.bf16 %v1103_v57, %v1103_v57 }
 0x213   :  { %1022 = vmatmul.msk.bf16.vlgmr.msra.gmra.mxu3 %vm660_vm7, %v643_v58  ;;  %726 = vst.msk [vmem:[#allocation7] sm:$0xf] %vm725_vm8, %v643_v58 }
 0x214   :  { %772 = dma.vmem_to_hbm [thread:$0]  %s768_s28, 64, %s770_s29, [#allocation8]  }
 0x296   :  { %v677_v0 = vpop.f32.mrf.mxu3 }
 0x297   :  { %v678_v1 = vadd.f32 %v1090_v63, %v677_v0 }
 0x299   :  { %v681_v2 = vsub.f32 0.0, %v678_v1 }
 0x29b   :  { %v682_v3 = vmul.f32 1.442695, %v681_v2 }
 0x29d   :  { %1104 = vpow2.f32 %v682_v3 }
 0x29e   :  { %v679_v4 = vpop.f32.mrf.mxu3 }
 0x2a3   :  { %v1105_v5 = vpop.eup %1104 }
 0x2a4   :  { %v684_v6 = vadd.f32 1.0, %v1105_v5 }
 0x2a6   :  { %1106 = vrcp.f32 %v684_v6 }
 0x2ac   :  { %v1107_v7 = vpop.eup %1106 }
 0x2ad   :  { %v686_v8 = vpack.c.bf16 %v1107_v7, %v1107_v7 }
 0x2af   :  { %1027 = vmatmul.msk.bf16.vlgmr.msra.gmra.mxu0 %vm698_vm10, %v686_v8  ;;  %728 = vst.msk [vmem:[#allocation9] sm:$0xf] %vm727_vm11, %v686_v8 }
 0x2b0   :  { %783 = dma.vmem_to_hbm [thread:$0]  %s779_s21, 64, %s781_s19, [#allocation8]  }
 0x32c   :  { %v715_v10 = vpop.f32.mrf.mxu0 }
 0x32d   :  { %v716_v11 = vadd.f32 %v1091_v9, %v715_v10 }
 0x32f   :  { %720 = vst.msk [vmem:[#allocation2] sm:$0xff] %vm719_vm12, %v716_v11 }
 0x330   :  { %739 = dma.vmem_to_hbm [thread:$0]  %s735_s6, 128, %s737_s24, [#allocation3]  }
 0x334   :  { %v717_v12 = vpop.f32.mrf.mxu0 }
 0x335   :  { %1228 = dma.done.wait [#allocation3], 128  }
 0x336   :  { %1229 = vsyncadd [#allocation3], 4294967168 }
 0x337   :  { %1230 = dma.done.wait [#allocation5], 128  }
 0x338   :  { %1231 = vsyncadd [#allocation5], 4294967168 }
 0x339   :  { %1232 = dma.done.wait [#allocation8], 128  }
 0x33a   :  { %1233 = vsyncadd [#allocation8], 4294967168 }
 0x33b   :  { %804 = vsyncpa [#allocation3], 1 }
 0x33c   :  { %805 = vsyncpa [#allocation5], 1 }
 0x33d   :  { %806 = vsyncpa [#allocation8], 1 }

</bundles_post_ra>
